<compile_context>
chip_gen: v6e
topology: v6e:2x2x1
jax: 0.10.0
libtpu: 0.0.40
codegen_flags: <defaults>
</compile_context>

<pallas_src>
import functools
import math

import jax
import jax.numpy as jnp
from jax import lax
from jax.experimental import pallas as pl
from jax.experimental.pallas import tpu as pltpu


_INV_SQRT2 = 1.0 / math.sqrt(2.0)
_SQRT_2_OVER_PI = math.sqrt(2.0 / math.pi)


def _round_up(x, mult):
    return -(-x // mult) * mult


def _vmem_capacity_bytes():
    try:
        return int(pltpu.get_tpu_info().vmem_capacity_bytes)
    except Exception:
        return 64 << 20  # conservative fallback: v7x per-TensorCore VMEM


def _ff_kernel(x_ref, w1_ref, b1_ref, w2_ref, b2_ref, o_ref, acc_ref, *,
               approx_gelu):
    """One (M-tile, hidden-tile) step. grid=(num_m_tiles, num_hidden_tiles);
    the hidden axis (last, 'arbitrary') is the reduction axis."""
    k = pl.program_id(1)

    @pl.when(k == 0)
    def _init():
        acc_ref[...] = jnp.zeros_like(acc_ref)

    # --- first GEMM: bf16 operands on the MXU, f32 accumulate --------------
    h = jnp.dot(x_ref[...], w1_ref[...],
                preferred_element_type=jnp.float32)            # (TM, TH) f32
    h = h + b1_ref[...]                                        # (1, TH) bias

    # --- GELU in f32 --------------------------------------------------------
    if approx_gelu:
        # tanh approximation: tanh goes to the EUP slot; <1e-3 deviation vs
        # exact erf, well under the bf16 operand noise.
        h = 0.5 * h * (1.0 + jnp.tanh(_SQRT_2_OVER_PI *
                                      (h + 0.044715 * h * h * h)))
    else:
        h = 0.5 * h * (1.0 + lax.erf(h * _INV_SQRT2))

    # nn.Dropout(p=0.0) is the identity -> no-op.

    # --- second GEMM: accumulate partial product over hidden tiles ----------
    acc_ref[...] += jnp.dot(h.astype(w2_ref.dtype), w2_ref[...],
                            preferred_element_type=jnp.float32)

    # --- finalize: add b2 once, cast, store ----------------------------------
    @pl.when(k == pl.num_programs(1) - 1)
    def _finalize():
        o_ref[...] = (acc_ref[...] + b2_ref[...]).astype(o_ref.dtype)


def prepare_ffn_params(w1, b1, w2, b2, *, compute_dtype=jnp.bfloat16):
    """One-time weight preparation (do at init time, NOT per forward call):
    pad the hidden dim to a 128 multiple and cast weights to the MXU dtype.
    Zero padding is exact (padded w2 rows are zero, so padded hidden channels
    contribute nothing)."""
    dim, hidden = w1.shape
    h_pad = _round_up(hidden, 128)
    if h_pad != hidden:
        w1 = jnp.pad(w1, ((0, 0), (0, h_pad - hidden)))
        b1 = jnp.pad(b1, (0, h_pad - hidden))
        w2 = jnp.pad(w2, ((0, h_pad - hidden), (0, 0)))
    return (w1.astype(compute_dtype),
            b1.reshape(1, h_pad).astype(jnp.float32),
            w2.astype(compute_dtype),
            b2.reshape(1, dim).astype(jnp.float32))


def feedforward_pallas(x, w1c, b1c, w2c, b2c, *, tm=768, out_dtype=None,
                       approx_gelu=True):
    """x: (..., dim). w1c/b1c/w2c/b2c come from prepare_ffn_params."""
    out_dtype = out_dtype or x.dtype
    *lead, dim = x.shape
    h_pad = w1c.shape[1]
    compute_dtype = w1c.dtype
    m = math.prod(lead) if lead else 1

    csize = jnp.dtype(compute_dtype).itemsize
    osize = jnp.dtype(out_dtype).itemsize

    def vmem_bytes(tm_, th_):
        # double-buffered pipelined blocks + single-buffered f32 accumulator
        return (2 * (tm_ * dim * csize        # x tile
                     + dim * th_ * csize      # w1 tile
                     + th_ * dim * csize      # w2 tile
                     + tm_ * dim * osize      # out tile
                     + th_ * 4 + dim * 4)     # bias tiles
                + tm_ * dim * 4)              # f32 accumulator scratch

    vmem_cap = _vmem_capacity_bytes()
    budget = min(vmem_cap - (16 << 20), 112 << 20)   # v7x-safe headroom

    # ---- hidden tile: take the whole (padded) hidden dim when it fits so
    # the reduction axis collapses and w1/w2 are fetched from HBM exactly
    # once for the entire kernel; otherwise the largest fitting 128-multiple
    # divisor of h_pad. -------------------------------------------------------
    m16 = _round_up(m, 16)
    tm_probe = min(_round_up(min(tm, m16), 16), m16)
    nh = h_pad // 128
    th_candidates = sorted({128 * d for d in range(1, nh + 1) if nh % d == 0},
                           reverse=True)
    th = next((t for t in th_candidates if vmem_bytes(tm_probe, t) <= budget),
              th_candidates[-1])

    # ---- M tile: as large as the budget allows (amortizes any residual
    # weight re-streaming), rounded to a 16-row sublane multiple. -------------
    tm = min(_round_up(tm, 16), m16)
    while tm > 16 and vmem_bytes(tm, th) > budget:
        tm = max(16, _round_up(tm // 2, 16))
    # Keep >=2 M tiles for large M so both v7x TensorCores get work.
    if _round_up(m, tm) // tm < 2 and m >= 512:
        tm = _round_up(-(-m // 2), 16)

    m_pad = _round_up(m, tm)
    grid = (m_pad // tm, h_pad // th)

    # Per-call input prep: only x is padded / cast (weights prepared once).
    x2d = x.reshape(m, dim)
    if m_pad != m:
        x2d = jnp.pad(x2d, ((0, m_pad - m), (0, 0)))
    xc = x2d.astype(compute_dtype)

    # Truthful traffic estimate: weights stream once when the hidden axis is a
    # single grid step (constant block index), else once per M tile.
    weight_passes = 1 if grid[1] == 1 else grid[0]
    cost = pl.CostEstimate(
        flops=2 * 2 * m_pad * dim * h_pad,            # two GEMMs
        transcendentals=m_pad * h_pad,                # one tanh/erf per element
        bytes_accessed=(xc.size * csize
                        + weight_passes * (w1c.size + w2c.size) * csize
                        + b1c.size * 4 + b2c.size * 4
                        + m_pad * dim * osize),
    )

    vmem_limit = int(min(max(vmem_bytes(tm, th) + (4 << 20), 32 << 20),
                         vmem_cap))

    kernel = functools.partial(_ff_kernel, approx_gelu=approx_gelu)

    out2d = pl.pallas_call(
        kernel,
        out_shape=jax.ShapeDtypeStruct((m_pad, dim), out_dtype),
        grid_spec=pltpu.PrefetchScalarGridSpec(
            num_scalar_prefetch=0,
            grid=grid,
            in_specs=[
                pl.BlockSpec((tm, dim), lambda i, k: (i, 0)),   # x tile
                pl.BlockSpec((dim, th), lambda i, k: (0, k)),   # w1 tile
                pl.BlockSpec((1, th),   lambda i, k: (0, k)),   # b1 tile
                pl.BlockSpec((th, dim), lambda i, k: (k, 0)),   # w2 tile
                pl.BlockSpec((1, dim),  lambda i, k: (0, 0)),   # b2 (resident)
            ],
            out_specs=pl.BlockSpec((tm, dim), lambda i, k: (i, 0)),
            scratch_shapes=[pltpu.VMEM((tm, dim), jnp.float32)],
        ),
        compiler_params=pltpu.CompilerParams(
            dimension_semantics=("parallel", "arbitrary"),
            vmem_limit_bytes=vmem_limit,
        ),
        cost_estimate=cost,
    )(xc, w1c, b1c, w2c, b2c)

    return out2d[:m].reshape(*lead, dim)


def feedforward_ref(x, w1, b1, w2, b2):
    h = jnp.einsum("...d,dh->...h", x, w1) + b1
    h = jax.nn.gelu(h, approximate=False)
    return jnp.einsum("...h,hd->...d", h, w2) + b2


if __name__ == "__main__":
    # Small transformer-FFN shapes consistent with the module's forward.
    batch, seq, dim, hidden = 2, 16, 128, 256

    key = jax.random.PRNGKey(0)
    kx, kw1, kb1, kw2, kb2 = jax.random.split(key, 5)

    x = jax.random.normal(kx, (batch, seq, dim), dtype=jnp.float32)

    # Deterministic init mimicking torch.nn.Linear's uniform(-1/sqrt(fan_in), +)
    lim1 = 1.0 / math.sqrt(dim)
    lim2 = 1.0 / math.sqrt(hidden)
    w1 = jax.random.uniform(kw1, (dim, hidden), jnp.float32, -lim1, lim1)
    b1 = jax.random.uniform(kb1, (hidden,), jnp.float32, -lim1, lim1)
    w2 = jax.random.uniform(kw2, (hidden, dim), jnp.float32, -lim2, lim2)
    b2 = jax.random.uniform(kb2, (dim,), jnp.float32, -lim2, lim2)

    # One-time weight preparation (hoisted out of the per-call path).
    w1c, b1c, w2c, b2c = prepare_ffn_params(w1, b1, w2, b2)

    out = feedforward_pallas(x, w1c, b1c, w2c, b2c)
    jax.block_until_ready(out)

    ref = feedforward_ref(x, w1, b1, w2, b2)
    assert out.shape == (batch, seq, dim)
    # bf16 MXU operands with f32 accumulation (+ tanh-GELU) -> loose tolerance.
    assert jnp.allclose(out, ref, atol=2e-2, rtol=2e-2), "mismatch vs reference"

    print("KERNEL_OK")
</pallas_src>

<mosaic_0001>
module attributes {stable_mosaic.version = 11 : i64} {
  func.func @_ff_kernel(%arg0: i32, %arg1: i32, %arg2: memref<32x128xbf16, #tpu.memory_space<vmem>>, %arg3: memref<128x256xbf16, #tpu.memory_space<vmem>>, %arg4: memref<1x256xf32, #tpu.memory_space<vmem>>, %arg5: memref<256x128xbf16, #tpu.memory_space<vmem>>, %arg6: memref<1x128xf32, #tpu.memory_space<vmem>>, %arg7: memref<32x128xf32, #tpu.memory_space<vmem>>, %arg8: memref<32x128xf32, #tpu.memory_space<vmem>>) attributes {dimension_semantics = [#tpu.dimension_semantics<parallel>, #tpu.dimension_semantics<arbitrary>], iteration_bounds = array<i64: 1, 1>, scalar_prefetch = 0 : i64, scratch_operands = 1 : i64, tpu.core_type = #tpu.core_type<tc>, window_params = [{transform_indices = @transform_0, window_bounds = array<i64: 32, 128>}, {transform_indices = @transform_1, window_bounds = array<i64: 128, 256>}, {transform_indices = @transform_2, window_bounds = array<i64: 1, 256>}, {transform_indices = @transform_3, window_bounds = array<i64: 256, 128>}, {pipeline_mode = #tpu.pipeline_mode<synchronous>, transform_indices = @transform_4, window_bounds = array<i64: 1, 128>}, {transform_indices = @transform_5, window_bounds = array<i64: 32, 128>}]} {
    %c0_i32 = arith.constant 0 : i32
    %0 = arith.cmpi eq, %arg1, %c0_i32 : i32
    %1 = arith.extui %0 : i1 to i32
    %c0_i32_0 = arith.constant 0 : i32
    %2 = arith.cmpi ne, %1, %c0_i32_0 : i32
    scf.if %2 {
      %cst_19 = arith.constant 0.000000e+00 : f32
      %31 = vector.broadcast %cst_19 : f32 to vector<32x128xf32>
      %c0_20 = arith.constant 0 : index
      %c0_21 = arith.constant 0 : index
      %32 = vector.load %arg8[%c0_20, %c0_21] : memref<32x128xf32, #tpu.memory_space<vmem>>, vector<32x128xf32>
      tpu.vector_store %arg8[%c0_20, %c0_21], %31 {strides = array<i32>} : memref<32x128xf32, #tpu.memory_space<vmem>>, vector<32x128xf32>,
    } else {
    }
    %c0 = arith.constant 0 : index
    %c0_1 = arith.constant 0 : index
    %3 = vector.load %arg2[%c0, %c0_1] : memref<32x128xbf16, #tpu.memory_space<vmem>>, vector<32x128xbf16>
    %c0_2 = arith.constant 0 : index
    %c0_3 = arith.constant 0 : index
    %4 = vector.load %arg3[%c0_2, %c0_3] : memref<128x256xbf16, #tpu.memory_space<vmem>>, vector<128x256xbf16>
    %cst = arith.constant dense<0.000000e+00> : vector<32x256xf32>
    %5 = tpu.matmul %3, %4, %cst {dimension_numbers = #tpu.dot_dimension_numbers<[1], [0], [0], [1], [0, 0, 1, 1], [], []>} : vector<32x128xbf16>, vector<128x256xbf16>, vector<32x256xf32> -> vector<32x256xf32>
    %c0_4 = arith.constant 0 : index
    %c0_5 = arith.constant 0 : index
    %6 = vector.load %arg4[%c0_4, %c0_5] : memref<1x256xf32, #tpu.memory_space<vmem>>, vector<1x256xf32>
    %7 = vector.broadcast %6 : vector<1x256xf32> to vector<32x256xf32>
    %8 = arith.addf %5, %7 : vector<32x256xf32>
    %cst_6 = arith.constant 5.000000e-01 : f32
    %9 = vector.broadcast %cst_6 : f32 to vector<32x256xf32>
    %10 = arith.mulf %9, %8 : vector<32x256xf32>
    %cst_7 = arith.constant 4.471500e-02 : f32
    %11 = vector.broadcast %cst_7 : f32 to vector<32x256xf32>
    %12 = arith.mulf %11, %8 : vector<32x256xf32>
    %13 = arith.mulf %12, %8 : vector<32x256xf32>
    %14 = arith.mulf %13, %8 : vector<32x256xf32>
    %15 = arith.addf %8, %14 : vector<32x256xf32>
    %cst_8 = arith.constant 0.797884583 : f32
    %16 = vector.broadcast %cst_8 : f32 to vector<32x256xf32>
    %17 = arith.mulf %16, %15 : vector<32x256xf32>
    %18 = math.tanh %17 : vector<32x256xf32>
    %cst_9 = arith.constant 1.000000e+00 : f32
    %19 = vector.broadcast %cst_9 : f32 to vector<32x256xf32>
    %20 = arith.addf %19, %18 : vector<32x256xf32>
    %21 = arith.mulf %10, %20 : vector<32x256xf32>
    %c0_10 = arith.constant 0 : index
    %c0_11 = arith.constant 0 : index
    %22 = vector.load %arg8[%c0_10, %c0_11] : memref<32x128xf32, #tpu.memory_space<vmem>>, vector<32x128xf32>
    %23 = arith.truncf %21 : vector<32x256xf32> to vector<32x256xbf16>
    %c0_12 = arith.constant 0 : index
    %c0_13 = arith.constant 0 : index
    %24 = vector.load %arg5[%c0_12, %c0_13] : memref<256x128xbf16, #tpu.memory_space<vmem>>, vector<256x128xbf16>
    %cst_14 = arith.constant dense<0.000000e+00> : vector<32x128xf32>
    %25 = tpu.matmul %23, %24, %cst_14 {dimension_numbers = #tpu.dot_dimension_numbers<[1], [0], [0], [1], [0, 0, 1, 1], [], []>} : vector<32x256xbf16>, vector<256x128xbf16>, vector<32x128xf32> -> vector<32x128xf32>
    %26 = arith.addf %22, %25 : vector<32x128xf32>
    %c0_15 = arith.constant 0 : index
    %c0_16 = arith.constant 0 : index
    %27 = vector.load %arg8[%c0_15, %c0_16] : memref<32x128xf32, #tpu.memory_space<vmem>>, vector<32x128xf32>
    tpu.vector_store %arg8[%c0_15, %c0_16], %26 {strides = array<i32>} : memref<32x128xf32, #tpu.memory_space<vmem>>, vector<32x128xf32>,
    %c0_i32_17 = arith.constant 0 : i32
    %28 = arith.cmpi eq, %arg1, %c0_i32_17 : i32
    %29 = arith.extui %28 : i1 to i32
    %c0_i32_18 = arith.constant 0 : i32
    %30 = arith.cmpi ne, %29, %c0_i32_18 : i32
    scf.if %30 {
      %c0_19 = arith.constant 0 : index
      %c0_20 = arith.constant 0 : index
      %31 = vector.load %arg8[%c0_19, %c0_20] : memref<32x128xf32, #tpu.memory_space<vmem>>, vector<32x128xf32>
      %c0_21 = arith.constant 0 : index
      %c0_22 = arith.constant 0 : index
      %32 = vector.load %arg6[%c0_21, %c0_22] : memref<1x128xf32, #tpu.memory_space<vmem>>, vector<1x128xf32>
      %33 = vector.broadcast %32 : vector<1x128xf32> to vector<32x128xf32>
      %34 = arith.addf %31, %33 : vector<32x128xf32>
      %c0_23 = arith.constant 0 : index
      %c0_24 = arith.constant 0 : index
      %35 = vector.load %arg7[%c0_23, %c0_24] : memref<32x128xf32, #tpu.memory_space<vmem>>, vector<32x128xf32>
      tpu.vector_store %arg7[%c0_23, %c0_24], %34 {strides = array<i32>} : memref<32x128xf32, #tpu.memory_space<vmem>>, vector<32x128xf32>,
    } else {
    }
    return
  }
  func.func @transform_0(%arg0: i32, %arg1: i32) -> (i32, i32) {
    %c0_i32 = arith.constant 0 : i32
    %c0_i32_0 = arith.constant 0 : i32
    return %arg0, %c0_i32 : i32, i32
  }
  func.func @transform_1(%arg0: i32, %arg1: i32) -> (i32, i32) {
    %c0_i32 = arith.constant 0 : i32
    %c0_i32_0 = arith.constant 0 : i32
    return %c0_i32, %arg1 : i32, i32
  }
  func.func @transform_2(%arg0: i32, %arg1: i32) -> (i32, i32) {
    %c0_i32 = arith.constant 0 : i32
    %c0_i32_0 = arith.constant 0 : i32
    return %c0_i32, %arg1 : i32, i32
  }
  func.func @transform_3(%arg0: i32, %arg1: i32) -> (i32, i32) {
    %c0_i32 = arith.constant 0 : i32
    %c0_i32_0 = arith.constant 0 : i32
    return %arg1, %c0_i32 : i32, i32
  }
  func.func @transform_4(%arg0: i32, %arg1: i32) -> (i32, i32) {
    %c0_i32 = arith.constant 0 : i32
    %c0_i32_0 = arith.constant 0 : i32
    %c0_i32_1 = arith.constant 0 : i32
    return %c0_i32, %c0_i32_0 : i32, i32
  }
  func.func @transform_5(%arg0: i32, %arg1: i32) -> (i32, i32) {
    %c0_i32 = arith.constant 0 : i32
    %c0_i32_0 = arith.constant 0 : i32
    return %arg0, %c0_i32 : i32, i32
  }
}

</mosaic_0001>

<bundles_post_ra>
// kernel: tpu_custom_call.1
= control target key start
LH: loop header
LB: loop body
LE: loop exit
PB: predicated region body
PF: predicated region fallthrough
CT: control target
= control target key end

     0   :  { %10 = vsyncpa [#allocation4], 0  ;;  %s860_s0 = inlined_call_operand.hbm [shape: bf16[32,128], index: 0, kind: input, shape index: {}]   ;;  %s861_s1 = inlined_call_operand.hbm [shape: bf16[128,256], index: 1, kind: input, shape index: {}]   ;;  %s862_s2 = inlined_call_operand.vmem [shape: f32[1,256], index: 2, kind: input, shape index: {}]   ;;  %s863_s3 = inlined_call_operand.hbm [shape: bf16[256,128], index: 3, kind: input, shape index: {}]   ;;  %s864_s4 = inlined_call_operand.vmem [shape: f32[1,128], index: 4, kind: input, shape index: {}]   ;;  %s865_s5 = inlined_call_operand.hbm [shape: f32[32,128], index: 5, kind: output, shape index: {}]  }
   0x1   :  { %11 = vsyncpa [#allocation7], 0 }
   0x2   :  { %12 = vsyncpa [#allocation5], 0  ;;  %s769_s18 = smov [#allocation6]  }
   0x3   :  { %s30_s19 = sshll.u32 %s769_s18, 4  ;;  %s31_s19 = int_to_ptr.vmem [resolvable:$true] %s30_s19 }
   0x4   :  { %s691_s20 = scalar_lea.vmem %s31_s19, 2048  ;;  %p696_p1 = scmp.lt.s32.totalorder %s31_s19, %s31_s19 }
   0x5   :  { %p692_p0 = scmp.ne.s32.totalorder %s31_s19, %s691_s20  ;;  %p697_p2 = scmp.lt.s32.totalorder %s691_s20, %s691_s20 }
   0x7   :  { %p698_p3 = por %p697_p2, %p696_p1 }
   0x9   :  { %p699_p4 = pnand %p698_p3, %p692_p0 }
   0xb   :  { %702 = shalt.err (!%p699_p4)
}
   0xc   :  { %s770_s21 = smov 128   ;;  %s771_s22 = smov 8  }
   0xd   :  { %36 = dma.hbm_to_vmem [thread:$0]  %s861_s1, 2048, %s31_s19, [#allocation7], %s770_s21, %s770_s21, %s771_s22  }
   0xe   :  { %s772_s25 = smov [#allocation3]  }
   0xf   :  { %s18_s26 = sshll.u32 %s772_s25, 4  ;;  %s19_s26 = int_to_ptr.vmem [resolvable:$true] %s18_s26 }
  0x10   :  { %s711_s27 = scalar_lea.vmem %s19_s26, 256  ;;  %p716_p6 = scmp.lt.s32.totalorder %s19_s26, %s19_s26 }
  0x11   :  { %p712_p5 = scmp.ne.s32.totalorder %s19_s26, %s711_s27  ;;  %p717_p7 = scmp.lt.s32.totalorder %s711_s27, %s711_s27 }
  0x13   :  { %p718_p8 = por %p717_p7, %p716_p6 }
  0x15   :  { %p719_p9 = pnand %p718_p8, %p712_p5 }
  0x17   :  { %722 = shalt.err (!%p719_p9)
}
  0x18   :  { %s773_s28 = smov 64   ;;  %s774_s29 = smov 4  }
  0x19   :  { %24 = dma.hbm_to_vmem [thread:$0]  %s860_s0, 256, %s19_s26, [#allocation4], %s773_s28, %s773_s28, %s774_s29  }
  0x1a   :  { %s775_s7 = smov [#allocation8]  }
  0x1b   :  { %s44_s8 = sshll.u32 %s775_s7, 4  ;;  %s45_s8 = int_to_ptr.vmem [resolvable:$true] %s44_s8 }
  0x1c   :  { %s731_s1 = scalar_lea.vmem %s45_s8, 2048  ;;  %p736_p11 = scmp.lt.s32.totalorder %s45_s8, %s45_s8 }
  0x1d   :  { %p732_p10 = scmp.ne.s32.totalorder %s45_s8, %s731_s1  ;;  %p737_p12 = scmp.lt.s32.totalorder %s731_s1, %s731_s1 }
  0x1f   :  { %p738_p13 = por %p737_p12, %p736_p11 }
  0x21   :  { %p739_p0 = pnand %p738_p13, %p732_p10 }
  0x23   :  { %742 = shalt.err (!%p739_p0)
}
  0x24   :  { %50 = dma.hbm_to_vmem [thread:$0]  %s863_s3, 2048, %s45_s8, [#allocation7], %s773_s28, %s773_s28, %s774_s29  }
  0x25   :  { %763 = dma.done.wait [#allocation4], 256  }
  0x26   :  { %764 = vsyncadd [#allocation4], 4294967040 }
  0x27   :  { %765 = dma.done.wait [#allocation7], 4096  }
  0x28   :  { %766 = vsyncadd [#allocation7], 4294963200  ;;  %v776_v0 = vmov 0   ;;  %v625_v1 = vld [vmem:[#allocation6 + $0x74] ss:$8 sps:$4 sm:$0xff]   ;;  %v655_v23 = vld [vmem:[#allocation8 + $0x68] sm:$0xff]   ;;  %v93_v35 = vlaneseq }
  0x29   :  { %227 = vmatprep.mubr.bf16.mxu0 %v776_v0  ;;  %v627_v2 = vld [vmem:[#allocation6 + $0x70] ss:$8 sps:$4 sm:$0xff]   ;;  %195 = vmatprep.subr.bf16.mxu0 %v625_v1  ;;  %v628_v3 = vld [vmem:[#allocation6 + $0x64] ss:$8 sps:$4 sm:$0xff]   ;;  %v630_v4 = vld [vmem:[#allocation6 + $0x60] ss:$8 sps:$4 sm:$0xff]  }
  0x2a   :  { %196 = vmatpush1.bf16.msra.mxu0 %v627_v2  ;;  %v631_v5 = vld [vmem:[#allocation6 + $0x54] ss:$8 sps:$4 sm:$0xff]   ;;  %v633_v6 = vld [vmem:[#allocation6 + $0x50] ss:$8 sps:$4 sm:$0xff]   ;;  %v634_v7 = vld [vmem:[#allocation6 + $0x44] ss:$8 sps:$4 sm:$0xff]  }
  0x2b   :  { %197 = vmatprep.subr.bf16.mxu0 %v628_v3  ;;  %v636_v8 = vld [vmem:[#allocation6 + $0x40] ss:$8 sps:$4 sm:$0xff]   ;;  %v637_v9 = vld [vmem:[#allocation6 + $0x34] ss:$8 sps:$4 sm:$0xff]   ;;  %v639_v10 = vld [vmem:[#allocation6 + $0x30] ss:$8 sps:$4 sm:$0xff]  }
  0x2c   :  { %v640_v11 = vld [vmem:[#allocation6 + $0x24] ss:$8 sps:$4 sm:$0xff]   ;;  %v642_v12 = vld [vmem:[#allocation6 + $0x20] ss:$8 sps:$4 sm:$0xff]   ;;  %v643_v13 = vld [vmem:[#allocation6 + $0x14] ss:$8 sps:$4 sm:$0xff]  }
  0x2d   :  { %v645_v14 = vld [vmem:[#allocation6 + $0x10] ss:$8 sps:$4 sm:$0xff]   ;;  %v646_v15 = vld [vmem:[#allocation6 + $0x4] ss:$8 sps:$4 sm:$0xff]   ;;  %v648_v16 = vld [vmem:[#allocation6] ss:$8 sps:$4 sm:$0xff]  }
  0x2e   :  { %198 = vmatpush1.bf16.msra.mxu0 %v630_v4  ;;  %v649_v17 = vld [vmem:[#allocation3] sm:$0xff]   ;;  %v650_v18 = vld [vmem:[#allocation3 + $0x8] sm:$0xff]   ;;  %v656_v24 = vld [vmem:[#allocation8 + $0x28] sm:$0xff]   ;;  %v94_v36 = vshrl.u32 %v93_v35, 7  ;;  %s777_s12 = smov [#allocation9]  }
  0x2f   :  { %199 = vmatprep.subr.bf16.mxu0 %v631_v5  ;;  %v651_v19 = vld [vmem:[#allocation8 + $0x78] sm:$0xff]   ;;  %v653_v21 = vld [vmem:[#allocation8 + $0x70] sm:$0xff]   ;;  %v657_v25 = vld [vmem:[#allocation8 + $0x60] sm:$0xff]   ;;  %s540_s13 = sshll.u32 %s777_s12, 4  ;;  %s541_s13 = int_to_ptr.vmem [resolvable:$true] %s540_s13 }
  0x30   :  { %v652_v20 = vld [vmem:[#allocation8 + $0x38] sm:$0xff]   ;;  %588 = vmatprep.subr.bf16.mxu1 %v651_v19  ;;  %v654_v22 = vld [vmem:[#allocation8 + $0x30] sm:$0xff]   ;;  %v658_v26 = vld [vmem:[#allocation8 + $0x20] sm:$0xff]   ;;  %v95_v37 = vsub.s32 0, %v94_v36  ;;  %v99_v39 = vsub.s32 1, %v94_v36  ;;  %p748_p2 = scmp.lt.s32.totalorder %s541_s13, %s541_s13 }
  0x31   :  { %589 = vmatpush3.bf16.msra.mxu1 %v652_v20  ;;  %v659_v27 = vld [vmem:[#allocation8 + $0x58] sm:$0xff]   ;;  %v661_v29 = vld [vmem:[#allocation8 + $0x50] sm:$0xff]   ;;  %v663_v31 = vld [vmem:[#allocation8 + $0x48] sm:$0xff]  }
  0x32   :  { %200 = vmatpush1.bf16.msra.mxu0 %v633_v6  ;;  %590 = vmatprep.subr.bf16.mxu1 %v653_v21  ;;  %v660_v28 = vld [vmem:[#allocation8 + $0x18] sm:$0xff]   ;;  %v662_v30 = vld [vmem:[#allocation8 + $0x10] sm:$0xff]   ;;  %v664_v32 = vld [vmem:[#allocation8 + $0x8] sm:$0xff]  }
  0x33   :  { %201 = vmatprep.subr.bf16.mxu0 %v634_v7  ;;  %v665_v33 = vld [vmem:[#allocation8 + $0x40] sm:$0xff]   ;;  %v91_v38 = vld [vmem:[%s862_s2] sm:$0x3] }
  0x34   :  { %v666_v34 = vld [vmem:[#allocation8] sm:$0xff]   ;;  %v96_v40 = vrot.slane %v91_v38, %v95_v37  ;;  %v100_v41 = vrot.slane %v91_v38, %v99_v39 }
  0x35   :  { %591 = vmatpush3.bf16.msra.mxu1 %v654_v22 }
  0x36   :  { %202 = vmatpush1.bf16.msra.mxu0 %v636_v8  ;;  %592 = vmatprep.subr.bf16.mxu1 %v655_v23 }
  0x37   :  { %203 = vmatprep.subr.bf16.mxu0 %v637_v9 }
  0x39   :  { %593 = vmatpush3.bf16.msra.mxu1 %v656_v24 }
  0x3a   :  { %204 = vmatpush1.bf16.msra.mxu0 %v639_v10  ;;  %594 = vmatprep.subr.bf16.mxu1 %v657_v25 }
  0x3b   :  { %205 = vmatprep.subr.bf16.mxu0 %v640_v11 }
  0x3d   :  { %595 = vmatpush3.bf16.msra.mxu1 %v658_v26 }
  0x3e   :  { %206 = vmatpush1.bf16.msra.mxu0 %v642_v12  ;;  %596 = vmatprep.subr.bf16.mxu1 %v659_v27 }
  0x3f   :  { %207 = vmatprep.subr.bf16.mxu0 %v643_v13 }
  0x41   :  { %597 = vmatpush3.bf16.msra.mxu1 %v660_v28 }
  0x42   :  { %208 = vmatpush1.bf16.msra.mxu0 %v645_v14  ;;  %598 = vmatprep.subr.bf16.mxu1 %v661_v29 }
  0x43   :  { %209 = vmatprep.subr.bf16.mxu0 %v646_v15 }
  0x45   :  { %599 = vmatpush3.bf16.msra.mxu1 %v662_v30 }
  0x46   :  { %210 = vmatpush1.bf16.msra.mxu0 %v648_v16  ;;  %600 = vmatprep.subr.bf16.mxu1 %v663_v31 }
  0x49   :  { %228 = vmatmul.mubr.bf16.vlgmr.msra.gmra.mxu0 %v649_v17  ;;  %601 = vmatpush3.bf16.msra.mxu1 %v664_v32 }
  0x4a   :  { %237 = vmatprep.mubr.bf16.mxu0 %v776_v0  ;;  %602 = vmatprep.subr.bf16.mxu1 %v665_v33 }
  0x4d   :  { %603 = vmatpush3.bf16.msra.mxu1 %v666_v34 }
  0x51   :  { %238 = vmatmul.mubr.bf16.gmra.mxu0 %v650_v18 }
 0x109   :  { %v229_v42 = vpop.f32.mrf.mxu0 }
 0x10a   :  { %v823_v43 = vadd.f32 %v229_v42, %v96_v40 }
 0x10b   :  { %v231_v44 = vpop.f32.mrf.mxu0 }
 0x10c   :  { %v256_v45 = vmul.f32 0.044715, %v823_v43  ;;  %v826_v46 = vadd.f32 %v231_v44, %v100_v41 }
 0x10d   :  { %v233_v47 = vpop.f32.mrf.mxu0 }
 0x10e   :  { %v264_v48 = vmul.f32 %v256_v45, %v823_v43  ;;  %v257_v49 = vmul.f32 0.044715, %v826_v46  ;;  %v234_v50 = vadd.f32 %v233_v47, %v96_v40  ;;  %v249_v42 = vmul.f32 0.5, %v826_v46 }
 0x10f   :  { %v235_v51 = vpop.f32.mrf.mxu0  ;;  %v248_v47 = vmul.f32 0.5, %v823_v43 }
 0x110   :  { %v272_v52 = vmul.f32 %v264_v48, %v823_v43  ;;  %v258_v53 = vmul.f32 0.044715, %v234_v50  ;;  %v236_v54 = vadd.f32 %v235_v51, %v100_v41  ;;  %v265_v55 = vmul.f32 %v257_v49, %v826_v46 }
 0x111   :  { %v239_v56 = vpop.f32.mrf.mxu0 }
 0x112   :  { %v266_v57 = vmul.f32 %v258_v53, %v234_v50  ;;  %v259_v58 = vmul.f32 0.044715, %v236_v54  ;;  %v832_v59 = vadd.f32 %v239_v56, %v96_v40  ;;  %v273_v61 = vmul.f32 %v265_v55, %v826_v46 }
 0x113   :  { %v241_v60 = vpop.f32.mrf.mxu0  ;;  %v280_v62 = vadd.f32 %v272_v52, %v823_v43  ;;  %v251_v44 = vmul.f32 0.5, %v236_v54 }
 0x114   :  { %v274_v63 = vmul.f32 %v266_v57, %v234_v50  ;;  %v260_v0 = vmul.f32 0.044715, %v832_v59  ;;  %v837_v1 = vadd.f32 %v241_v60, %v100_v41  ;;  %v267_v2 = vmul.f32 %v259_v58, %v236_v54 }
 0x115   :  { %v243_v3 = vpop.f32.mrf.mxu0  ;;  %v281_v4 = vadd.f32 %v273_v61, %v826_v46  ;;  %v288_v5 = vmul.f32 0.7978846, %v280_v62 }
 0x116   :  { %v268_v6 = vmul.f32 %v260_v0, %v832_v59  ;;  %v261_v7 = vmul.f32 0.044715, %v837_v1  ;;  %v244_v8 = vadd.f32 %v243_v3, %v96_v40  ;;  %v275_v9 = vmul.f32 %v267_v2, %v236_v54 }
 0x117   :  { %v245_v10 = vpop.f32.mrf.mxu0  ;;  %v289_v11 = vmul.f32 0.7978846, %v281_v4  ;;  %v282_v12 = vadd.f32 %v274_v63, %v234_v50  ;;  %v250_v40 = vmul.f32 0.5, %v234_v50  ;;  %v253_v50 = vmul.f32 0.5, %v837_v1 }
 0x118   :  { %v276_v13 = vmul.f32 %v268_v6, %v832_v59  ;;  %v269_v14 = vmul.f32 %v261_v7, %v837_v1  ;;  %v262_v15 = vmul.f32 0.044715, %v244_v8  ;;  %v246_v16 = vadd.f32 %v245_v10, %v100_v41 }
 0x119   :  { %v283_v17 = vadd.f32 %v275_v9, %v236_v54  ;;  %667 = vtanh.f32 %v289_v11  ;;  %v290_v18 = vmul.f32 0.7978846, %v282_v12  ;;  %v254_v63 = vmul.f32 0.5, %v244_v8 }
 0x11a   :  { %v277_v19 = vmul.f32 %v269_v14, %v837_v1  ;;  %v270_v20 = vmul.f32 %v262_v15, %v244_v8  ;;  %v263_v21 = vmul.f32 0.044715, %v246_v16  ;;  %669 = vtanh.f32 %v288_v5 }
 0x11b   :  { %v291_v22 = vmul.f32 0.7978846, %v283_v17  ;;  %671 = vtanh.f32 %v290_v18  ;;  %v284_v23 = vadd.f32 %v276_v13, %v832_v59  ;;  %v255_v46 = vmul.f32 0.5, %v246_v16 }
 0x11c   :  { %v278_v24 = vmul.f32 %v270_v20, %v244_v8  ;;  %v271_v25 = vmul.f32 %v263_v21, %v246_v16  ;;  %v285_v26 = vadd.f32 %v277_v19, %v837_v1  ;;  %v252_v3 = vmul.f32 0.5, %v832_v59  ;;  %v587_v1 = vld [vmem:[%s864_s4] ss:$0 sm:$0xff]  ;;  %s743_s4 = scalar_lea.vmem %s541_s13, 512 }
 0x11d   :  { %673 = vtanh.f32 %v291_v22  ;;  %v292_v27 = vmul.f32 0.7978846, %v284_v23  ;;  %p744_p1 = scmp.ne.s32.totalorder %s541_s13, %s743_s4  ;;  %p749_p3 = scmp.lt.s32.totalorder %s743_s4, %s743_s4 }
 0x11e   :  { %v279_v28 = vmul.f32 %v271_v25, %v246_v16  ;;  %v293_v29 = vmul.f32 0.7978846, %v285_v26  ;;  %v286_v30 = vadd.f32 %v278_v24, %v244_v8 }
 0x11f   :  { %p750_p4 = por %p749_p3, %p748_p2 }
 0x120   :  { %v287_v31 = vadd.f32 %v279_v28, %v246_v16  ;;  %675 = vtanh.f32 %v293_v29  ;;  %v294_v32 = vmul.f32 0.7978846, %v286_v30 }
 0x121   :  { %677 = vtanh.f32 %v292_v27  ;;  %p751_p5 = pnand %p750_p4, %p744_p1 }
 0x122   :  { %v295_v33 = vmul.f32 0.7978846, %v287_v31  ;;  %679 = vtanh.f32 %v294_v32 }
 0x124   :  { %681 = vtanh.f32 %v295_v33 }
 0x126   :  { %v668_v34 = vpop.eup %667 }
 0x127   :  { %v670_v35 = vpop.eup %669  ;;  %v305_v37 = vadd.f32 1.0, %v668_v34 }
 0x128   :  { %v672_v36 = vpop.eup %671  ;;  %v304_v41 = vadd.f32 1.0, %v670_v35 }
 0x129   :  { %v306_v38 = vadd.f32 1.0, %v672_v36  ;;  %v313_v51 = vmul.f32 %v305_v37, %v249_v42 }
 0x12a   :  { %v674_v39 = vpop.eup %673  ;;  %v312_v55 = vmul.f32 %v304_v41, %v248_v47 }
 0x12b   :  { %v307_v45 = vadd.f32 1.0, %v674_v39  ;;  %v314_v48 = vmul.f32 %v306_v38, %v250_v40 }
 0x12d   :  { %v676_v49 = vpop.eup %675  ;;  %v315_v52 = vmul.f32 %v307_v45, %v251_v44  ;;  %v324_v58 = vpack.c.bf16 %v314_v48, %v312_v55 }
 0x12e   :  { %v678_v53 = vpop.eup %677  ;;  %v309_v60 = vadd.f32 1.0, %v676_v49 }
 0x12f   :  { %v680_v56 = vpop.eup %679  ;;  %v325_v57 = vpack.c.bf16 %v315_v52, %v313_v51  ;;  %v308_v43 = vadd.f32 1.0, %v678_v53 }
 0x130   :  { %v310_v61 = vadd.f32 1.0, %v680_v56  ;;  %v317_v0 = vmul.f32 %v309_v60, %v253_v50 }
 0x131   :  { %v682_v62 = vpop.eup %681  ;;  %488 = vmatprep.mubr.bf16.mxu1 %v325_v57  ;;  %v316_v6 = vmul.f32 %v308_v43, %v252_v3 }
 0x132   :  { %489 = vmatmul.mubr.bf16.vlgmr.msra.gmra.mxu1 %v324_v58  ;;  %v311_v54 = vadd.f32 1.0, %v682_v62  ;;  %v318_v4 = vmul.f32 %v310_v61, %v254_v63 }
 0x134   :  { %v319_v2 = vmul.f32 %v311_v54, %v255_v46  ;;  %v326_v7 = vpack.c.bf16 %v318_v4, %v316_v6 }
 0x136   :  { %v327_v5 = vpack.c.bf16 %v319_v2, %v317_v0 }
 0x138   :  { %496 = vmatprep.mubr.bf16.mxu1 %v327_v5 }
 0x13a   :  { %497 = vmatmul.mubr.bf16.gmra.mxu1 %v326_v7 }
 0x1f2   :  { %v604_v9 = vpop.f32.mrf.mxu1 }
 0x1f4   :  { %v605_v10 = vpop.f32.mrf.mxu1 }
 0x1f5   :  { %v606_v11 = vadd.f32 %v605_v10, %v604_v9 }
 0x1f6   :  { %v607_v12 = vpop.f32.mrf.mxu1 }
 0x1f7   :  { %v527_v8 = vadd.f32 %v606_v11, %v587_v1 }
 0x1f8   :  { %v608_v13 = vpop.f32.mrf.mxu1 }
 0x1f9   :  { %531 = vst [vmem:[#allocation9] sm:$0xff] %v527_v8  ;;  %v609_v14 = vadd.f32 %v608_v13, %v607_v12 }
 0x1fa   :  { %v610_v15 = vpop.f32.mrf.mxu1 }
 0x1fb   :  { %v528_v59 = vadd.f32 %v609_v14, %v587_v1 }
 0x1fc   :  { %v611_v16 = vpop.f32.mrf.mxu1 }
 0x1fd   :  { %532 = vst [vmem:[#allocation9 + $0x8] sm:$0xff] %v528_v59  ;;  %v612_v17 = vadd.f32 %v611_v16, %v610_v15 }
 0x1fe   :  { %v613_v18 = vpop.f32.mrf.mxu1 }
 0x1ff   :  { %v529_v19 = vadd.f32 %v612_v17, %v587_v1 }
 0x200   :  { %v614_v20 = vpop.f32.mrf.mxu1 }
 0x201   :  { %533 = vst [vmem:[#allocation9 + $0x10] sm:$0xff] %v529_v19  ;;  %v615_v21 = vadd.f32 %v614_v20, %v613_v18 }
 0x203   :  { %v530_v22 = vadd.f32 %v615_v21, %v587_v1 }
 0x205   :  { %534 = vst [vmem:[#allocation9 + $0x18] sm:$0xff] %v530_v22 }
 0x206   :  { %754 = shalt.err (!%p751_p5)
}
 0x207   :  { %546 = dma.vmem_to_hbm [thread:$0]  %s541_s13, 512, %s865_s5, [#allocation5], %s770_s21, %s770_s21, %s771_s22  }
 0x208   :  { %767 = dma.done.wait [#allocation5], 512  }
 0x209   :  { %768 = vsyncadd [#allocation5], 4294966784 }
 0x20a   :  { %550 = vsyncpa [#allocation4], 1 }
 0x20b   :  { %551 = vsyncpa [#allocation7], 1 }
 0x20c   :  { %552 = vsyncpa [#allocation5], 1 }

</bundles_post_ra>
